<compile_context>
chip_gen: v7x
topology: tpu7x:2x2x1
jax: 0.10.0
libtpu: 0.0.40
codegen_flags: <defaults>
</compile_context>

<pallas_src>
import functools

import jax
import jax.numpy as jnp
from jax.experimental import pallas as pl
from jax.experimental.pallas import tpu as pltpu

_LANE = 128          # TPU vreg lane width
_BF16_SUBLANE = 16   # bf16 packs 16 rows per sublane tile


def _round_up(x, m):
    return (x + m - 1) // m * m


def _dqn_kernel(x_ref, w1_ref, b1_ref, w2_ref, b2_ref, w3_ref, b3_ref, o_ref):
    # Layer 1: Linear(n_obs -> 64) + ReLU. bf16 MXU matmul, f32 accumulate,
    # bias + ReLU in f32 on the VPU.
    h1 = jnp.dot(x_ref[...], w1_ref[...], preferred_element_type=jnp.float32)
    h1 = jnp.maximum(h1 + b1_ref[...], 0.0)
    # Layer 2: Linear(64 -> 32) + ReLU.
    h2 = jnp.dot(h1.astype(w2_ref.dtype), w2_ref[...],
                 preferred_element_type=jnp.float32)
    h2 = jnp.maximum(h2 + b2_ref[...], 0.0)
    # Layer 3: Linear(32 -> n_actions_padded), no activation. Output slab is
    # lane-dense (padded to a multiple of 128) -> unmasked stores.
    out = jnp.dot(h2.astype(w3_ref.dtype), w3_ref[...],
                  preferred_element_type=jnp.float32)
    o_ref[...] = (out + b3_ref[...]).astype(o_ref.dtype)


@functools.partial(jax.jit, static_argnames=("block_batch", "use_bf16"))
def dqn_forward(x, w1, b1, w2, b2, w3, b3, block_batch=512, use_bf16=True):
    batch, n_obs = x.shape
    n_actions = w3.shape[1]
    n_act_pad = _round_up(n_actions, _LANE)

    # Batch tile: multiple of 16 (bf16 sublane), capped at block_batch.
    tb = min(block_batch, _round_up(batch, _BF16_SUBLANE))
    b_pad = _round_up(batch, tb)
    n_tiles = b_pad // tb

    compute_dtype = jnp.bfloat16 if use_bf16 else jnp.float32

    # Pad batch rows with zeros; pad layer-3 output columns to a lane-dense slab.
    if b_pad != batch:
        x = jnp.pad(x, ((0, b_pad - batch), (0, 0)))
    if n_act_pad != n_actions:
        w3 = jnp.pad(w3, ((0, 0), (0, n_act_pad - n_actions)))
        b3 = jnp.pad(b3, ((0, 0), (0, n_act_pad - n_actions)))

    x_c = x.astype(compute_dtype)
    w1_c = w1.astype(compute_dtype)
    w2_c = w2.astype(compute_dtype)
    w3_c = w3.astype(compute_dtype)
    b1_c = b1.astype(jnp.float32)
    b2_c = b2.astype(jnp.float32)
    b3_c = b3.astype(jnp.float32)

    def pinned(arr):
        # Whole (tiny) array as one block, same block every grid step ->
        # stays resident in VMEM across the batch loop.
        return pl.BlockSpec(arr.shape, lambda i: (0,) * arr.ndim)

    flops = 2 * b_pad * (n_obs * 64 + 64 * 32 + 32 * n_act_pad)
    bytes_accessed = (
        x_c.size * x_c.dtype.itemsize
        + b_pad * n_act_pad * 4
        + sum(a.size * a.dtype.itemsize
              for a in (w1_c, b1_c, w2_c, b2_c, w3_c, b3_c))
    )

    out_padded = pl.pallas_call(
        _dqn_kernel,
        out_shape=jax.ShapeDtypeStruct((b_pad, n_act_pad), jnp.float32),
        grid=(n_tiles,),
        in_specs=[
            pl.BlockSpec((tb, n_obs), lambda i: (i, 0)),   # x: batch-tiled
            pinned(w1_c), pinned(b1_c),
            pinned(w2_c), pinned(b2_c),
            pinned(w3_c), pinned(b3_c),
        ],
        out_specs=pl.BlockSpec((tb, n_act_pad), lambda i: (i, 0)),
        compiler_params=pltpu.CompilerParams(
            dimension_semantics=("parallel",),      # megacore split on v7x
            vmem_limit_bytes=32 * 1024 * 1024,      # fits all chips incl. v7x
        ),
        cost_estimate=pl.CostEstimate(
            flops=flops, transcendentals=0, bytes_accessed=bytes_accessed),
    )(x_c, w1_c, b1_c, w2_c, b2_c, w3_c, b3_c)

    return out_padded[:batch, :n_actions]


def init_dqn_params(key, n_observations, n_actions):
    """Deterministic PyTorch-style init: U(-1/sqrt(fan_in), 1/sqrt(fan_in))."""
    dims = [(n_observations, 64), (64, 32), (32, n_actions)]
    params = []
    for (fan_in, fan_out) in dims:
        key, kw, kb = jax.random.split(key, 3)
        bound = 1.0 / jnp.sqrt(jnp.float32(fan_in))
        w = jax.random.uniform(kw, (fan_in, fan_out), jnp.float32, -bound, bound)
        b = jax.random.uniform(kb, (1, fan_out), jnp.float32, -bound, bound)
        params.extend([w, b])
    return params


def dqn_reference_f32(x, w1, b1, w2, b2, w3, b3):
    h1 = jnp.maximum(x @ w1 + b1, 0.0)
    h2 = jnp.maximum(h1 @ w2 + b2, 0.0)
    return h2 @ w3 + b3


def dqn_reference_bf16(x, w1, b1, w2, b2, w3, b3):
    # Mirrors the kernel's precision: bf16 operands, f32 accumulation,
    # f32 bias + ReLU.
    bf = jnp.bfloat16
    h1 = jnp.dot(x.astype(bf), w1.astype(bf), preferred_element_type=jnp.float32)
    h1 = jnp.maximum(h1 + b1, 0.0)
    h2 = jnp.dot(h1.astype(bf), w2.astype(bf), preferred_element_type=jnp.float32)
    h2 = jnp.maximum(h2 + b2, 0.0)
    out = jnp.dot(h2.astype(bf), w3.astype(bf), preferred_element_type=jnp.float32)
    return out + b3


if __name__ == "__main__":
    key = jax.random.PRNGKey(0)
    n_observations = 16
    n_actions = 4
    batch = 8

    key, kx = jax.random.split(key)
    x = jax.random.normal(kx, (batch, n_observations), jnp.float32)
    params = init_dqn_params(key, n_observations, n_actions)

    # Small-batch path (single grid step).
    out = dqn_forward(x, *params)
    out = jax.block_until_ready(out)
    assert out.shape == (batch, n_actions)

    ref_bf16 = dqn_reference_bf16(x, *params)
    assert jnp.allclose(out, ref_bf16, atol=2e-3, rtol=2e-3), "mismatch vs bf16 reference"
    ref_f32 = dqn_reference_f32(x, *params)
    assert jnp.allclose(out, ref_f32, atol=5e-2, rtol=5e-2), "mismatch vs f32 reference"

    # Larger batch exercises the batch grid (>1 tile) and row padding.
    key, kx2 = jax.random.split(key)
    x_big = jax.random.normal(kx2, (600, n_observations), jnp.float32)
    out_big = jax.block_until_ready(dqn_forward(x_big, *params))
    assert out_big.shape == (600, n_actions)
    ref_big = dqn_reference_bf16(x_big, *params)
    assert jnp.allclose(out_big, ref_big, atol=2e-3, rtol=2e-3), "mismatch (batched grid)"

    print("KERNEL_OK")
</pallas_src>

<mosaic_0001>
module attributes {stable_mosaic.version = 11 : i64} {
  func.func @_dqn_kernel(%arg0: i32, %arg1: memref<16x16xbf16, #tpu.memory_space<vmem>>, %arg2: memref<16x64xbf16, #tpu.memory_space<vmem>>, %arg3: memref<1x64xf32, #tpu.memory_space<vmem>>, %arg4: memref<64x32xbf16, #tpu.memory_space<vmem>>, %arg5: memref<1x32xf32, #tpu.memory_space<vmem>>, %arg6: memref<32x128xbf16, #tpu.memory_space<vmem>>, %arg7: memref<1x128xf32, #tpu.memory_space<vmem>>, %arg8: memref<16x128xf32, #tpu.memory_space<vmem>>) attributes {dimension_semantics = [#tpu.dimension_semantics<parallel>], iteration_bounds = array<i64: 1>, scalar_prefetch = 0 : i64, scratch_operands = 0 : i64, tpu.core_type = #tpu.core_type<tc>, window_params = [{transform_indices = @transform_0, window_bounds = array<i64: 16, 16>}, {pipeline_mode = #tpu.pipeline_mode<synchronous>, transform_indices = @transform_1, window_bounds = array<i64: 16, 64>}, {pipeline_mode = #tpu.pipeline_mode<synchronous>, transform_indices = @transform_2, window_bounds = array<i64: 1, 64>}, {pipeline_mode = #tpu.pipeline_mode<synchronous>, transform_indices = @transform_3, window_bounds = array<i64: 64, 32>}, {pipeline_mode = #tpu.pipeline_mode<synchronous>, transform_indices = @transform_4, window_bounds = array<i64: 1, 32>}, {pipeline_mode = #tpu.pipeline_mode<synchronous>, transform_indices = @transform_5, window_bounds = array<i64: 32, 128>}, {pipeline_mode = #tpu.pipeline_mode<synchronous>, transform_indices = @transform_6, window_bounds = array<i64: 1, 128>}, {transform_indices = @transform_7, window_bounds = array<i64: 16, 128>}]} {
    %c0 = arith.constant 0 : index
    %c0_0 = arith.constant 0 : index
    %0 = vector.load %arg1[%c0, %c0_0] : memref<16x16xbf16, #tpu.memory_space<vmem>>, vector<16x16xbf16>
    %c0_1 = arith.constant 0 : index
    %c0_2 = arith.constant 0 : index
    %1 = vector.load %arg2[%c0_1, %c0_2] : memref<16x64xbf16, #tpu.memory_space<vmem>>, vector<16x64xbf16>
    %cst = arith.constant dense<0.000000e+00> : vector<16x64xf32>
    %2 = tpu.matmul %0, %1, %cst {dimension_numbers = #tpu.dot_dimension_numbers<[1], [0], [0], [1], [0, 0, 1, 1], [], []>} : vector<16x16xbf16>, vector<16x64xbf16>, vector<16x64xf32> -> vector<16x64xf32>
    %c0_3 = arith.constant 0 : index
    %c0_4 = arith.constant 0 : index
    %3 = vector.load %arg3[%c0_3, %c0_4] : memref<1x64xf32, #tpu.memory_space<vmem>>, vector<1x64xf32>
    %4 = vector.broadcast %3 : vector<1x64xf32> to vector<16x64xf32>
    %5 = arith.addf %2, %4 : vector<16x64xf32>
    %cst_5 = arith.constant 0.000000e+00 : f32
    %6 = vector.broadcast %cst_5 : f32 to vector<16x64xf32>
    %7 = arith.maximumf %5, %6 : vector<16x64xf32>
    %8 = arith.truncf %7 : vector<16x64xf32> to vector<16x64xbf16>
    %c0_6 = arith.constant 0 : index
    %c0_7 = arith.constant 0 : index
    %9 = vector.load %arg4[%c0_6, %c0_7] : memref<64x32xbf16, #tpu.memory_space<vmem>>, vector<64x32xbf16>
    %cst_8 = arith.constant dense<0.000000e+00> : vector<16x32xf32>
    %10 = tpu.matmul %8, %9, %cst_8 {dimension_numbers = #tpu.dot_dimension_numbers<[1], [0], [0], [1], [0, 0, 1, 1], [], []>} : vector<16x64xbf16>, vector<64x32xbf16>, vector<16x32xf32> -> vector<16x32xf32>
    %c0_9 = arith.constant 0 : index
    %c0_10 = arith.constant 0 : index
    %11 = vector.load %arg5[%c0_9, %c0_10] : memref<1x32xf32, #tpu.memory_space<vmem>>, vector<1x32xf32>
    %12 = vector.broadcast %11 : vector<1x32xf32> to vector<16x32xf32>
    %13 = arith.addf %10, %12 : vector<16x32xf32>
    %cst_11 = arith.constant 0.000000e+00 : f32
    %14 = vector.broadcast %cst_11 : f32 to vector<16x32xf32>
    %15 = arith.maximumf %13, %14 : vector<16x32xf32>
    %16 = arith.truncf %15 : vector<16x32xf32> to vector<16x32xbf16>
    %c0_12 = arith.constant 0 : index
    %c0_13 = arith.constant 0 : index
    %17 = vector.load %arg6[%c0_12, %c0_13] : memref<32x128xbf16, #tpu.memory_space<vmem>>, vector<32x128xbf16>
    %cst_14 = arith.constant dense<0.000000e+00> : vector<16x128xf32>
    %18 = tpu.matmul %16, %17, %cst_14 {dimension_numbers = #tpu.dot_dimension_numbers<[1], [0], [0], [1], [0, 0, 1, 1], [], []>} : vector<16x32xbf16>, vector<32x128xbf16>, vector<16x128xf32> -> vector<16x128xf32>
    %c0_15 = arith.constant 0 : index
    %c0_16 = arith.constant 0 : index
    %19 = vector.load %arg7[%c0_15, %c0_16] : memref<1x128xf32, #tpu.memory_space<vmem>>, vector<1x128xf32>
    %20 = vector.broadcast %19 : vector<1x128xf32> to vector<16x128xf32>
    %21 = arith.addf %18, %20 : vector<16x128xf32>
    %c0_17 = arith.constant 0 : index
    %c0_18 = arith.constant 0 : index
    %22 = vector.load %arg8[%c0_17, %c0_18] : memref<16x128xf32, #tpu.memory_space<vmem>>, vector<16x128xf32>
    tpu.vector_store %arg8[%c0_17, %c0_18], %21 {strides = array<i32>} : memref<16x128xf32, #tpu.memory_space<vmem>>, vector<16x128xf32>,
    return
  }
  func.func @transform_0(%arg0: i32) -> (i32, i32) {
    %c0_i32 = arith.constant 0 : i32
    %c0_i32_0 = arith.constant 0 : i32
    return %arg0, %c0_i32 : i32, i32
  }
  func.func @transform_1(%arg0: i32) -> (i32, i32) {
    %c0_i32 = arith.constant 0 : i32
    %c0_i32_0 = arith.constant 0 : i32
    %c0_i32_1 = arith.constant 0 : i32
    return %c0_i32, %c0_i32_0 : i32, i32
  }
  func.func @transform_2(%arg0: i32) -> (i32, i32) {
    %c0_i32 = arith.constant 0 : i32
    %c0_i32_0 = arith.constant 0 : i32
    %c0_i32_1 = arith.constant 0 : i32
    return %c0_i32, %c0_i32_0 : i32, i32
  }
  func.func @transform_3(%arg0: i32) -> (i32, i32) {
    %c0_i32 = arith.constant 0 : i32
    %c0_i32_0 = arith.constant 0 : i32
    %c0_i32_1 = arith.constant 0 : i32
    return %c0_i32, %c0_i32_0 : i32, i32
  }
  func.func @transform_4(%arg0: i32) -> (i32, i32) {
    %c0_i32 = arith.constant 0 : i32
    %c0_i32_0 = arith.constant 0 : i32
    %c0_i32_1 = arith.constant 0 : i32
    return %c0_i32, %c0_i32_0 : i32, i32
  }
  func.func @transform_5(%arg0: i32) -> (i32, i32) {
    %c0_i32 = arith.constant 0 : i32
    %c0_i32_0 = arith.constant 0 : i32
    %c0_i32_1 = arith.constant 0 : i32
    return %c0_i32, %c0_i32_0 : i32, i32
  }
  func.func @transform_6(%arg0: i32) -> (i32, i32) {
    %c0_i32 = arith.constant 0 : i32
    %c0_i32_0 = arith.constant 0 : i32
    %c0_i32_1 = arith.constant 0 : i32
    return %c0_i32, %c0_i32_0 : i32, i32
  }
  func.func @transform_7(%arg0: i32) -> (i32, i32) {
    %c0_i32 = arith.constant 0 : i32
    %c0_i32_0 = arith.constant 0 : i32
    return %arg0, %c0_i32 : i32, i32
  }
}

</mosaic_0001>

<bundles_post_ra>
// kernel: dqn_forward.1
= control target key start
LH: loop header
LB: loop body
LE: loop exit
PB: predicated region body
PF: predicated region fallthrough
CT: control target
= control target key end

     0   :  { %v318_v0 = vmov 0.0   ;;  %vm319_vm0 = vmmov 0   ;;  %vm49_vm1 = vcmask 130048   ;;  %vm136_vm2 = vcmask 523264   ;;  %s399_s1 = inlined_call_operand.vmem [shape: bf16[16,64], index: 1, kind: input, shape index: {}]   ;;  %s400_s0 = inlined_call_operand.vmem [shape: bf16[16,16], index: 0, kind: input, shape index: {}]   ;;  %s401_s3 = inlined_call_operand.vmem [shape: bf16[64,32], index: 3, kind: input, shape index: {}]   ;;  %s402_s2 = inlined_call_operand.vmem [shape: f32[1,64], index: 2, kind: input, shape index: {}]   ;;  %s403_s5 = inlined_call_operand.vmem [shape: bf16[32,128], index: 5, kind: input, shape index: {}]   ;;  %s404_s4 = inlined_call_operand.vmem [shape: f32[1,32], index: 4, kind: input, shape index: {}]   ;;  %s405_s6 = inlined_call_operand.vmem [shape: f32[1,128], index: 6, kind: input, shape index: {}]   ;;  %s406_s7 = inlined_call_operand.vmem [shape: f32[16,128], index: 7, kind: output, shape index: {}]  }
   0x1   :  { %282 = vmatprep.subr.bf16.mxu0 %v318_v0  ;;  %v310_v1 = vld [vmem:[%s399_s1] sm:$0xff]   ;;  %284 = vmatprep.mubr.msk.bf16.mxu0 %vm319_vm0, %v318_v0  ;;  %v313_v4 = vld [vmem:[%s401_s3 + $0x8] sm:$0xff]   ;;  %v314_v5 = vld [vmem:[%s401_s3 + $0x10] sm:$0xff]   ;;  %vm207_vm3 = vcmask 261120  }
   0x2   :  { %v311_v2 = vld [vmem:[%s400_s0] sm:$0xff]   ;;  %288 = vmatprep.subr.bf16.mxu1 %v318_v0  ;;  %296 = vmatprep.mubr.msk.bf16.mxu1 %vm319_vm0, %v318_v0  ;;  %v315_v6 = vld [vmem:[%s401_s3 + $0x18] sm:$0xff]   ;;  %v317_v18 = vld [vmem:[%s403_s5 + $0x8] sm:$0xff]  }
   0x3   :  { %283 = vmatpush3.bf16.msra.mxu0 %v310_v1  ;;  %v312_v3 = vld [vmem:[%s401_s3] sm:$0xff]  }
   0x4   :  { %300 = vmatprep.subr.bf16.mxu0 %v318_v0  ;;  %289 = vmatpush3.bf16.msra.mxu1 %v312_v3  ;;  %v258_v7 = vld [vmem:[%s402_s2] ss:$0 sm:$0xff] }
   0x5   :  { %290 = vmatprep.subr.bf16.mxu1 %v318_v0  ;;  %v316_v17 = vld [vmem:[%s403_s5] sm:$0xff]  }
   0x6   :  { %285 = vmatmul.mubr.msk.bf16.vlgmr.msra.gmra.mrb[0].mxu0 %vm49_vm1, %v311_v2  ;;  %v262_v19 = vld [vmem:[%s404_s4] ss:$0 sm:$0xff] }
   0x7   :  { %304 = vmatprep.mubr.msk.bf16.mxu0 %vm319_vm0, %v318_v0  ;;  %301 = vmatpush3.bf16.msra.mxu0 %v316_v17  ;;  %v268_v29 = vld [vmem:[%s405_s6] ss:$0 sm:$0xff] }
   0x8   :  { %291 = vmatpush3.bf16.msra.mxu1 %v313_v4  ;;  %302 = vmatprep.subr.bf16.mxu0 %v318_v0 }
   0x9   :  { %292 = vmatprep.subr.bf16.mxu1 %v318_v0 }
   0xb   :  { %303 = vmatpush3.bf16.msra.mxu0 %v317_v18 }
   0xc   :  { %293 = vmatpush3.bf16.msra.mxu1 %v314_v5 }
   0xd   :  { %294 = vmatprep.subr.bf16.mxu1 %v318_v0 }
  0x10   :  { %295 = vmatpush3.bf16.msra.mxu1 %v315_v6 }
  0xd9   :  { %v87_v8 = vpop.f32.mrb[0].mxu0 }
  0xda   :  { %v88_v9 = vadd.f32 %v258_v7, %v87_v8  ;;  %v286_v10 = vpop.f32.mrb[1].mxu0 }
  0xdb   :  { %v90_v11 = vpop.f32.mrb[2].mxu0 }
  0xdc   :  { %v91_v12 = vadd.f32 %v258_v7, %v90_v11  ;;  %v287_v13 = vpop.f32.mrb[3].mxu0  ;;  %v94_v14 = vmax.f32 %v88_v9, 0.0 }
  0xde   :  { %v95_v15 = vmax.f32 %v91_v12, 0.0 }
  0xe0   :  { %v96_v16 = vpack.c.bf16 %v95_v15, %v94_v14 }
  0xe2   :  { %297 = vmatmul.mubr.msk.bf16.vlgmr.msra.gmra.mrb[0].mxu1 %vm136_vm2, %v96_v16 }
 0x1b5   :  { %v174_v20 = vpop.f32.mrb[0].mxu1 }
 0x1b6   :  { %v175_v21 = vadd.f32 %v262_v19, %v174_v20  ;;  %v298_v22 = vpop.f32.mrb[1].mxu1 }
 0x1b7   :  { %v177_v23 = vpop.f32.mrb[2].mxu1 }
 0x1b8   :  { %v178_v24 = vadd.f32 %v262_v19, %v177_v23  ;;  %v299_v25 = vpop.f32.mrb[3].mxu1  ;;  %v181_v26 = vmax.f32 %v175_v21, 0.0 }
 0x1ba   :  { %v182_v27 = vmax.f32 %v178_v24, 0.0 }
 0x1bc   :  { %v183_v28 = vpack.c.bf16 %v182_v27, %v181_v26 }
 0x1be   :  { %305 = vmatmul.mubr.msk.bf16.vlgmr.msra.gmra.mrb[4].mxu0 %vm207_vm3, %v183_v28 }
 0x291   :  { %v245_v30 = vpop.f32.mrb[4].mxu0 }
 0x292   :  { %v246_v31 = vadd.f32 %v268_v29, %v245_v30  ;;  %v306_v32 = vpop.f32.mrb[5].mxu0 }
 0x293   :  { %v248_v33 = vpop.f32.mrb[6].mxu0 }
 0x294   :  { %252 = vst [vmem:[%s406_s7] sm:$0xff] %v246_v31  ;;  %v249_v34 = vadd.f32 %v268_v29, %v248_v33  ;;  %v307_v35 = vpop.f32.mrb[7].mxu0 }
 0x296   :  { %253 = vst [vmem:[%s406_s7 + $0x8] sm:$0xff] %v249_v34 }

</bundles_post_ra>
